<compile_context>
chip_gen: v5e
topology: v5e:2x2
jax: 0.10.0
libtpu: 0.0.40
codegen_flags: <defaults>
</compile_context>

<pallas_src>
import functools

import jax
import jax.numpy as jnp
from jax import lax
from jax.experimental import pallas as pl
from jax.experimental.pallas import tpu as pltpu


def _sync_loss_kernel(a_ref, c_ref, partial_ref, *, true_b, block_rows):
    # a_ref, c_ref: (block_rows, D) tiles in VMEM.
    # partial_ref: (1, 1, 128) lane-dense VMEM output block holding this block's partial
    #              sum of clamp(log(cos), -100) replicated across lanes.
    i = pl.program_id(0)

    a = a_ref[...].astype(jnp.float32)
    c = c_ref[...].astype(jnp.float32)

    dot = jnp.sum(a * c, axis=-1, keepdims=True)          # (TB, 1)
    na2 = jnp.sum(a * a, axis=-1, keepdims=True)          # (TB, 1)
    nc2 = jnp.sum(c * c, axis=-1, keepdims=True)          # (TB, 1)

    # PyTorch cosine_similarity: clamp the product of squared norms at eps^2 (eps=1e-8),
    # then a single rsqrt (EUP slot, off the VPU critical path).
    cos = dot * lax.rsqrt(jnp.maximum(na2 * nc2, jnp.float32(1e-16)))

    # Mask padded rows of the last block (out-of-bounds tile content is unspecified).
    row = i * block_rows + lax.broadcasted_iota(jnp.int32, cos.shape, 0)
    cos = jnp.where(row < true_b, cos, jnp.float32(1.0))  # log(1) = 0 -> no contribution

    # BCE with label == 1 everywhere: -log(p), log clamped at -100 (PyTorch BCELoss).
    log_p = jnp.maximum(jnp.log(cos), jnp.float32(-100.0))

    partial_ref[...] = jnp.full(partial_ref.shape, jnp.sum(log_p), jnp.float32)


def _vmem_capacity_bytes():
    try:
        return int(pltpu.get_tpu_info().vmem_capacity_bytes)
    except Exception:
        return 64 << 20  # conservative: v7x per-TensorCore physical VMEM


def _choose_tiling(B, D, itemsize):
    """Pick (block_rows, vmem_limit_bytes) from the generation's VMEM capacity."""
    padded_d = pl.cdiv(D, 128) * 128  # lane padding of a (tb, D) tile in VMEM
    vmem_phys = _vmem_capacity_bytes()
    # Leave headroom below physical VMEM; cap well under the 128 MiB chips too.
    vmem_limit = int(max(min(vmem_phys - (16 << 20), 100 << 20), 32 << 20))
    # Per-row VMEM footprint: 2 inputs x 2 pipeline buffers (lane padded) plus f32
    # upcast temporaries for both operands (conservative if the compiler fuses them).
    per_row = 4 * padded_d * itemsize + 2 * padded_d * 4
    tile_budget = vmem_limit // 2  # keep half the limit free for compiler scratch/slack
    tb = max(8, (tile_budget // per_row) // 8 * 8)
    if tb >= B:
        tb = B  # single full-array block: legal for any B
    return tb, vmem_limit


def sync_loss(audio_emb, coef_emb, *, block_rows=None, cast_to_bf16=False):
    """audio_emb, coef_emb: (B, D) float arrays (f32 or bf16). Returns scalar f32 loss."""
    assert audio_emb.shape == coef_emb.shape and audio_emb.ndim == 2
    if cast_to_bf16:
        audio_emb = audio_emb.astype(jnp.bfloat16)
        coef_emb = coef_emb.astype(jnp.bfloat16)
    B, D = audio_emb.shape
    itemsize = jnp.dtype(audio_emb.dtype).itemsize

    auto_tb, vmem_limit = _choose_tiling(B, D, itemsize)
    if block_rows is None:
        tb = auto_tb
    else:
        tb = B if B <= block_rows else block_rows
        assert tb == B or tb % 8 == 0, "block_rows must be a multiple of 8"

    grid = pl.cdiv(B, tb)

    cost = pl.CostEstimate(
        flops=6 * B * D,
        transcendentals=2 * B,  # rsqrt + log per row
        bytes_accessed=2 * B * D * itemsize + grid * 128 * 4,
    )

    kernel = functools.partial(_sync_loss_kernel, true_b=B, block_rows=tb)

    # Per-block partials in a lane-dense output; grid axis is fully parallel so v7x can
    # shard blocks across both TensorCores.
    partials = pl.pallas_call(
        kernel,
        out_shape=jax.ShapeDtypeStruct((grid, 1, 128), jnp.float32),
        grid_spec=pltpu.PrefetchScalarGridSpec(
            num_scalar_prefetch=0,
            grid=(grid,),
            in_specs=[
                pl.BlockSpec((tb, D), lambda i: (i, 0)),
                pl.BlockSpec((tb, D), lambda i: (i, 0)),
            ],
            out_specs=pl.BlockSpec((1, 1, 128), lambda i: (i, 0, 0)),
        ),
        compiler_params=pltpu.CompilerParams(
            dimension_semantics=("parallel",),
            vmem_limit_bytes=vmem_limit,
        ),
        cost_estimate=cost,
    )(audio_emb, coef_emb)

    # Tiny final reduction (grid elements) + negate + mean over the true batch size.
    return -jnp.sum(partials[:, 0, 0]) / B


def sync_loss_ref(audio_emb, coef_emb):
    """Pure-JAX reference matching PyTorch SyncLoss.forward (product-of-norms eps clamp)."""
    a = audio_emb.astype(jnp.float32)
    c = coef_emb.astype(jnp.float32)
    dot = jnp.sum(a * c, axis=-1)
    na2 = jnp.sum(a * a, axis=-1)
    nc2 = jnp.sum(c * c, axis=-1)
    cos = dot / jnp.sqrt(jnp.maximum(na2 * nc2, jnp.float32(1e-16)))
    log_p = jnp.maximum(jnp.log(cos), -100.0)
    return -jnp.mean(log_p)


if __name__ == "__main__":
    key = jax.random.PRNGKey(0)
    k1, k2, k3, k4 = jax.random.split(key, 4)

    # Small demo shape consistent with the module's forward (positive audio/coef pairs
    # so cosine similarity is in (0, 1] and BCE is well-defined).
    B, D = 8, 32
    audio_emb = jax.random.normal(k1, (B, D), dtype=jnp.float32)
    coef_emb = audio_emb + 0.1 * jax.random.normal(k2, (B, D), dtype=jnp.float32)

    loss = sync_loss(audio_emb, coef_emb)
    jax.block_until_ready(loss)
    ref = sync_loss_ref(audio_emb, coef_emb)
    assert jnp.allclose(loss, ref, rtol=2e-5, atol=1e-5), (loss, ref)

    # Larger, non-divisible batch with an explicit small block: exercises the multi-block
    # grid, parallel per-block partials, and last-block row masking (1040 = 512+512+16).
    B2, D2 = 1040, 32
    a2 = jax.random.normal(k3, (B2, D2), dtype=jnp.float32)
    c2 = a2 + 0.1 * jax.random.normal(k4, (B2, D2), dtype=jnp.float32)
    loss2 = sync_loss(a2, c2, block_rows=512)
    jax.block_until_ready(loss2)
    ref2 = sync_loss_ref(a2, c2)
    assert jnp.allclose(loss2, ref2, rtol=2e-5, atol=1e-5), (loss2, ref2)

    # Adaptive tile path + bandwidth-halving bf16 input cast (loose tolerance: inputs
    # are rounded to bf16, math/accumulation stays f32).
    loss3 = sync_loss(a2, c2, cast_to_bf16=True)
    jax.block_until_ready(loss3)
    assert jnp.isfinite(loss3)
    assert jnp.allclose(loss3, ref2, rtol=5e-2, atol=2e-3), (loss3, ref2)

    print("KERNEL_OK")
</pallas_src>

<mosaic_0001>
module attributes {stable_mosaic.version = 11 : i64} {
  func.func @_sync_loss_kernel(%arg0: i32, %arg1: memref<8x32xf32, #tpu.memory_space<vmem>>, %arg2: memref<8x32xf32, #tpu.memory_space<vmem>>, %arg3: memref<1x1x128xf32, #tpu.memory_space<vmem>>) attributes {dimension_semantics = [#tpu.dimension_semantics<parallel>], iteration_bounds = array<i64: 1>, scalar_prefetch = 0 : i64, scratch_operands = 0 : i64, tpu.core_type = #tpu.core_type<tc>, window_params = [{transform_indices = @transform_0, window_bounds = array<i64: 8, 32>}, {transform_indices = @transform_1, window_bounds = array<i64: 8, 32>}, {transform_indices = @transform_2, window_bounds = array<i64: 1, 1, 128>}]} {
    %c0 = arith.constant 0 : index
    %c0_0 = arith.constant 0 : index
    %0 = vector.load %arg1[%c0, %c0_0] : memref<8x32xf32, #tpu.memory_space<vmem>>, vector<8x32xf32>
    %c0_1 = arith.constant 0 : index
    %c0_2 = arith.constant 0 : index
    %1 = vector.load %arg2[%c0_1, %c0_2] : memref<8x32xf32, #tpu.memory_space<vmem>>, vector<8x32xf32>
    %2 = arith.mulf %0, %1 : vector<8x32xf32>
    %cst = arith.constant dense<0.000000e+00> : vector<8xf32>
    %3 = vector.multi_reduction <add>, %2, %cst [1] : vector<8x32xf32> to vector<8xf32>
    %4 = vector.shape_cast %3 : vector<8xf32> to vector<8x1xf32>
    %5 = arith.mulf %0, %0 : vector<8x32xf32>
    %cst_3 = arith.constant dense<0.000000e+00> : vector<8xf32>
    %6 = vector.multi_reduction <add>, %5, %cst_3 [1] : vector<8x32xf32> to vector<8xf32>
    %7 = vector.shape_cast %6 : vector<8xf32> to vector<8x1xf32>
    %8 = arith.mulf %1, %1 : vector<8x32xf32>
    %cst_4 = arith.constant dense<0.000000e+00> : vector<8xf32>
    %9 = vector.multi_reduction <add>, %8, %cst_4 [1] : vector<8x32xf32> to vector<8xf32>
    %10 = vector.shape_cast %9 : vector<8xf32> to vector<8x1xf32>
    %11 = arith.mulf %7, %10 : vector<8x1xf32>
    %cst_5 = arith.constant 1.000000e-16 : f32
    %12 = vector.broadcast %cst_5 : f32 to vector<8x1xf32>
    %13 = arith.maximumf %11, %12 : vector<8x1xf32>
    %14 = math.rsqrt %13 : vector<8x1xf32>
    %15 = arith.mulf %4, %14 : vector<8x1xf32>
    %c8_i32 = arith.constant 8 : i32
    %16 = arith.muli %arg0, %c8_i32 : i32
    %17 = tpu.iota {dimensions = array<i32: 0>} : vector<8x1xi32>
    %18 = vector.broadcast %16 : i32 to vector<8x1xi32>
    %19 = arith.addi %18, %17 : vector<8x1xi32>
    %c8_i32_6 = arith.constant 8 : i32
    %20 = vector.broadcast %c8_i32_6 : i32 to vector<8x1xi32>
    %21 = arith.cmpi slt, %19, %20 : vector<8x1xi32>
    %cst_7 = arith.constant 1.000000e+00 : f32
    %22 = vector.broadcast %cst_7 : f32 to vector<8x1xf32>
    %23 = arith.select %21, %15, %22 : vector<8x1xi1>, vector<8x1xf32>
    %24 = math.log %23 : vector<8x1xf32>
    %cst_8 = arith.constant -1.000000e+02 : f32
    %25 = vector.broadcast %cst_8 : f32 to vector<8x1xf32>
    %26 = arith.maximumf %24, %25 : vector<8x1xf32>
    %27 = vector.shape_cast %26 : vector<8x1xf32> to vector<1x8x1xf32>
    %cst_9 = arith.constant dense<0.000000e+00> : vector<1xf32>
    %28 = vector.multi_reduction <add>, %27, %cst_9 [1, 2] : vector<1x8x1xf32> to vector<1xf32>
    %29 = vector.shape_cast %28 : vector<1xf32> to vector<1x1x1xf32>
    %30 = vector.extract %29[0, 0, 0] : f32 from vector<1x1x1xf32>
    %31 = vector.broadcast %30 : f32 to vector<1x1x128xf32>
    %c0_10 = arith.constant 0 : index
    %c0_11 = arith.constant 0 : index
    %c0_12 = arith.constant 0 : index
    %32 = vector.load %arg3[%c0_10, %c0_11, %c0_12] : memref<1x1x128xf32, #tpu.memory_space<vmem>>, vector<1x1x128xf32>
    tpu.vector_store %arg3[%c0_10, %c0_11, %c0_12], %31 {strides = array<i32>} : memref<1x1x128xf32, #tpu.memory_space<vmem>>, vector<1x1x128xf32>,
    return
  }
  func.func @transform_0(%arg0: i32) -> (i32, i32) {
    %c0_i32 = arith.constant 0 : i32
    %c0_i32_0 = arith.constant 0 : i32
    return %arg0, %c0_i32 : i32, i32
  }
  func.func @transform_1(%arg0: i32) -> (i32, i32) {
    %c0_i32 = arith.constant 0 : i32
    %c0_i32_0 = arith.constant 0 : i32
    return %arg0, %c0_i32 : i32, i32
  }
  func.func @transform_2(%arg0: i32) -> (i32, i32, i32) {
    %c0_i32 = arith.constant 0 : i32
    %c0_i32_0 = arith.constant 0 : i32
    %c0_i32_1 = arith.constant 0 : i32
    return %arg0, %c0_i32, %c0_i32_0 : i32, i32, i32
  }
}

</mosaic_0001>

<bundles_post_ra>
// kernel: tpu_custom_call.1
= control target key start
LH: loop header
LB: loop body
LE: loop exit
PB: predicated region body
PF: predicated region fallthrough
CT: control target
= control target key end

     0   :  { %7 = vsyncpa [#allocation3], 0  ;;  %s223_s0 = inlined_call_operand.hbm [shape: f32[8,32], index: 0, kind: input, shape index: {}]   ;;  %s224_s1 = inlined_call_operand.hbm [shape: f32[8,32], index: 1, kind: input, shape index: {}]   ;;  %s225_s2 = inlined_call_operand.hbm [shape: f32[1,1,128], index: 2, kind: output, shape index: {}]  }
   0x1   :  { %8 = vsyncpa [#allocation6], 0 }
   0x2   :  { %9 = vsyncpa [#allocation4], 0  ;;  %s15_s11 = sshll.u32 %s223_s0, 4  ;;  %s196_s12 = smov [#allocation2]   ;;  %s16_s11 = int_to_ptr.hbm [resolvable:$true] %s15_s11 }
   0x3   :  { %s17_s13 = sshll.u32 %s196_s12, 4  ;;  %s26_s16 = sshll.u32 %s224_s1, 4  ;;  %s18_s13 = int_to_ptr.vmem [resolvable:$true] %s17_s13  ;;  %s27_s16 = int_to_ptr.hbm [resolvable:$true] %s26_s16 }
   0x4   :  { %20 = dma.hbm_to_vmem [thread:$0]  %s16_s11, 128, %s18_s13, [#allocation3]  }
   0x5   :  { %s197_s17 = smov [#allocation5]  }
   0x6   :  { %s28_s18 = sshll.u32 %s197_s17, 4  ;;  %s29_s18 = int_to_ptr.vmem [resolvable:$true] %s28_s18 }
   0x7   :  { %31 = dma.hbm_to_vmem [thread:$0]  %s27_s16, 128, %s29_s18, [#allocation6]  }
   0x8   :  { %190 = dma.done.wait [#allocation3], 128  }
   0x9   :  { %191 = vsyncadd [#allocation3], 4294967168 }
   0xa   :  { %192 = dma.done.wait [#allocation6], 128  }
   0xb   :  { %193 = vsyncadd [#allocation6], 4294967168  ;;  %v40_v0 = vld [vmem:[#allocation2] sm:$0xff]  ;;  %vm43_vm0 = vcmask 261120   ;;  %v41_v1 = vld [vmem:[#allocation5] sm:$0xff]  ;;  %vm78_vm4 = vcmask 7168  }
   0xc   :  { %v47_v2 = vmul.f32 %v40_v0, %v40_v0  ;;  %v42_v3 = vmul.f32 %v41_v1, %v40_v0  ;;  %v51_v6 = vmul.f32 %v41_v1, %v41_v1  ;;  %s198_s0 = smov [#allocation7]   ;;  %s98_s21 = sshll.u32 %s225_s2, 4  ;;  %s99_s21 = int_to_ptr.hbm [resolvable:$true] %s98_s21 }
   0xd   :  { %s96_s1 = sshll.u32 %s198_s0, 4  ;;  %s97_s1 = int_to_ptr.vmem [resolvable:$true] %s96_s1 }
   0xe   :  { %v48_v4 = vsel %vm43_vm0, %v47_v2, 0.0  ;;  %v44_v5 = vsel %vm43_vm0, %v42_v3, 0.0  ;;  %v52_v7 = vsel %vm43_vm0, %v51_v6, 0.0 }
   0xf   :  { %49 = vadd.xlane.f32.xlu0 %v48_v4  ;;  %45 = vadd.xlane.f32.xlu1 %v44_v5 }
  0x17   :  { %53 = vadd.xlane.f32.xlu0 %v52_v7 }
  0x82   :  { %v50_v8 = vpop.xlane.xlu0 %49  ;;  %v46_v18 = vpop.xlane.xlu1 %45 }
  0x8a   :  { %v54_v9 = vpop.xlane.xlu0 %53 }
  0x8b   :  { %v55_v10 = vmul.f32 %v54_v9, %v50_v8 }
  0x8d   :  { %v56_v11 = vmax.f32 %v55_v10, 1e-16 }
  0x8f   :  { %114 = vrsqrt.f32 %v56_v11  ;;  %vm63_vm2 = vweird.f32 %v56_v11 }
  0x95   :  { %v115_v12 = vpop.eup %114 }
  0x96   :  { %v58_v13 = vmul.f32 %v115_v12, %v56_v11  ;;  %vm64_vm1 = vweird.f32 %v115_v12 }
  0x97   :  { %vm65_vm3 = vmor %vm63_vm2, %vm64_vm1 }
  0x98   :  { %v59_v14 = vmul.f32 %v115_v12, %v58_v13 }
  0x9a   :  { %v60_v15 = vmul.f32 0.5, %v59_v14 }
  0x9c   :  { %v61_v16 = vsub.f32 1.5, %v60_v15 }
  0x9e   :  { %v62_v17 = vmul.f32 %v115_v12, %v61_v16 }
  0xa0   :  { %v66_v19 = vsel %vm65_vm3, %v115_v12, %v62_v17 }
  0xa1   :  { %v67_v20 = vmul.f32 %v66_v19, %v46_v18 }
  0xa3   :  { %116 = vlog2.f32 %v67_v20 }
  0xa9   :  { %v117_v21 = vpop.eup %116 }
  0xaa   :  { %v76_v22 = vmul.f32 0.6931472, %v117_v21 }
  0xac   :  { %v77_v23 = vmax.f32 %v76_v22, -100.0 }
  0xae   :  { %v79_v24 = vsel %vm78_vm4, %v77_v23, 0.0 }
  0xaf   :  { %80 = vadd.xlane.f32.xlu1 %v79_v24 }
 0x122   :  { %v81_v25 = vpop.xlane.xlu1 %80 }
 0x123   :  { %v82_v26 = vrot.slane %v81_v25, 4 }
 0x125   :  { %v83_v27 = vadd.f32 %v82_v26, %v81_v25 }
 0x127   :  { %v84_v28 = vrot.slane %v83_v27, 2 }
 0x129   :  { %v85_v29 = vadd.f32 %v84_v28, %v83_v27 }
 0x12b   :  { %v86_v30 = vrot.slane %v85_v29, 1 }
 0x12d   :  { %v87_v31 = vadd.f32 %v86_v30, %v85_v29 }
 0x12f   :  { %109 = vpush %v87_v31 }
 0x160   :  { %s110_s22 = spop %109 }
 0x161   :  { %v89_v32 = vstv %s110_s22 }
 0x162   :  { %90 = vst [vmem:[#allocation7] sm:$0x1] %v89_v32 }
 0x163   :  { %101 = dma.vmem_to_hbm [thread:$0]  %s97_s1, 16, %s99_s21, [#allocation4]  }
 0x164   :  { %194 = dma.done.wait [#allocation4], 16  }
 0x165   :  { %195 = vsyncadd [#allocation4], 4294967280 }
 0x166   :  { %106 = vsyncpa [#allocation3], 1 }
 0x167   :  { %107 = vsyncpa [#allocation6], 1 }
 0x168   :  { %108 = vsyncpa [#allocation4], 1 }

</bundles_post_ra>
